<compile_context>
chip_gen: v7x
topology: tpu7x:2x2x1
jax: 0.10.0
libtpu: 0.0.40
codegen_flags: <defaults>
</compile_context>

<pallas_src>
import jax
import jax.numpy as jnp
from jax.experimental import pallas as pl
from jax.experimental.pallas import tpu as pltpu


# --------------------------------------------------------------------------- #
# Kernels
# --------------------------------------------------------------------------- #
def make_qnetwork_kernel(split_qb: bool):
    """Build the fused forward kernel.

    split_qb=True  -> Q-tower hidden layer runs as two lane-aligned HxH dots
                      (requires H % 128 == 0).
    split_qb=False -> Q-tower hidden layer runs as one fused [2H,2H]
                      block-diagonal dot (small H; 2H fits one MXU tile).
    """

    def linear(x, w_ref, b_ref):
        w = w_ref[...]
        # Cast activations to the weight dtype at the dot (bf16 fast path on
        # v6e/v7x); accumulate in fp32; bias add / ReLU stay fp32 (v5e-safe).
        return jnp.dot(x.astype(w.dtype), w,
                       preferred_element_type=jnp.float32) + b_ref[...]

    def linear_relu(x, w_ref, b_ref):
        return jnp.maximum(linear(x, w_ref, b_ref), 0.0)

    if split_qb:
        def kernel(
            x_ref,                       # [TB, S+A] fp32
            wf1_ref, bf1_ref,            # fused state/action layer 1
            wf2_ref, bf2_ref,            # fused state/action layer 2
            wqa_ref, bqa_ref,            # fused Q towers layer a: [64, 2H]
            wq1b_ref, bq1b_ref,          # Q1 hidden: [H, H]
            wq2b_ref, bq2b_ref,          # Q2 hidden: [H, H]
            wq1c_ref, wq2c_ref, bqc_ref,  # heads padded to 2 lanes each
            out_ref,                     # [TB, 2]  (col 0 = Q1, col 1 = Q2)
        ):
            x = x_ref[...]
            h = linear_relu(linear_relu(x, wf1_ref, bf1_ref), wf2_ref, bf2_ref)
            h = linear_relu(h, wqa_ref, bqa_ref)          # [TB, 2H]
            H = wq1b_ref.shape[0]
            # H % 128 == 0 -> lane-aligned halves; the slices are free (no XLU
            # shuffle) and the two HxH dots skip the zero blocks that a fused
            # [2H, 2H] block-diagonal matmul would push through the MXU.
            h1 = linear_relu(h[:, :H], wq1b_ref, bq1b_ref)
            h2 = linear_relu(h[:, H:], wq2b_ref, bq2b_ref)
            # Heads: wq1c padded to [:, 0], wq2c padded to [:, 1] -> the two
            # tiny dots combine with an add, no lane concat needed.
            w1c = wq1c_ref[...]
            w2c = wq2c_ref[...]
            q = (jnp.dot(h1.astype(w1c.dtype), w1c,
                         preferred_element_type=jnp.float32)
                 + jnp.dot(h2.astype(w2c.dtype), w2c,
                           preferred_element_type=jnp.float32)
                 + bqc_ref[...])
            out_ref[...] = q.astype(out_ref.dtype)
    else:
        def kernel(
            x_ref,
            wf1_ref, bf1_ref,
            wf2_ref, bf2_ref,
            wqa_ref, bqa_ref,            # [64, 2H]
            wqb_ref, bqb_ref,            # block-diag [2H, 2H] (small H only)
            wqc_ref, bqc_ref,            # block-diag [2H, 2]
            out_ref,
        ):
            x = x_ref[...]
            h = linear_relu(linear_relu(x, wf1_ref, bf1_ref), wf2_ref, bf2_ref)
            h = linear_relu(linear_relu(h, wqa_ref, bqa_ref), wqb_ref, bqb_ref)
            out_ref[...] = linear(h, wqc_ref, bqc_ref).astype(out_ref.dtype)

    return kernel


# --------------------------------------------------------------------------- #
# Parameter construction / packing
# --------------------------------------------------------------------------- #
def make_params(state_dim, action_dim, hidden_size, key):
    """Deterministic raw (unfused) params. Weights stored [in, out] (pre-transposed)."""
    def linear_params(key, fan_in, fan_out):
        kw, kb = jax.random.split(key)
        bound = 1.0 / jnp.sqrt(fan_in)
        w = jax.random.uniform(kw, (fan_in, fan_out), jnp.float32, -bound, bound)
        b = jax.random.uniform(kb, (1, fan_out), jnp.float32, -bound, bound)
        return w, b

    keys = jax.random.split(key, 10)
    p = {}
    p["ws1"], p["bs1"] = linear_params(keys[0], state_dim, 32)
    p["ws2"], p["bs2"] = linear_params(keys[1], 32, 32)
    p["wa1"], p["ba1"] = linear_params(keys[2], action_dim, 32)
    p["wa2"], p["ba2"] = linear_params(keys[3], 32, 32)
    p["wq1a"], p["bq1a"] = linear_params(keys[4], 64, hidden_size)
    p["wq1b"], p["bq1b"] = linear_params(keys[5], hidden_size, hidden_size)
    p["wq1c"], p["bq1c"] = linear_params(keys[6], hidden_size, 1)
    p["wq2a"], p["bq2a"] = linear_params(keys[7], 64, hidden_size)
    p["wq2b"], p["bq2b"] = linear_params(keys[8], hidden_size, hidden_size)
    p["wq2c"], p["bq2c"] = linear_params(keys[9], hidden_size, 1)
    return p


def _block_diag(a, b):
    za = jnp.zeros((a.shape[0], b.shape[1]), a.dtype)
    zb = jnp.zeros((b.shape[0], a.shape[1]), b.dtype)
    return jnp.concatenate(
        [jnp.concatenate([a, za], axis=1), jnp.concatenate([zb, b], axis=1)], axis=0)


def pack_params(params, weight_dtype=jnp.bfloat16, *, split_qb=False):
    """Fuse the raw per-layer params into the kernel's packed layout."""
    wf1 = _block_diag(params["ws1"], params["wa1"]).astype(weight_dtype)
    bf1 = jnp.concatenate([params["bs1"], params["ba1"]], axis=1).astype(jnp.float32)
    wf2 = _block_diag(params["ws2"], params["wa2"]).astype(weight_dtype)
    bf2 = jnp.concatenate([params["bs2"], params["ba2"]], axis=1).astype(jnp.float32)
    wqa = jnp.concatenate([params["wq1a"], params["wq2a"]], axis=1).astype(weight_dtype)
    bqa = jnp.concatenate([params["bq1a"], params["bq2a"]], axis=1).astype(jnp.float32)
    packed = [wf1, bf1, wf2, bf2, wqa, bqa]

    bqc = jnp.concatenate([params["bq1c"], params["bq2c"]], axis=1).astype(jnp.float32)
    if split_qb:
        H = params["wq1b"].shape[0]
        wq1b = params["wq1b"].astype(weight_dtype)
        bq1b = params["bq1b"].astype(jnp.float32)
        wq2b = params["wq2b"].astype(weight_dtype)
        bq2b = params["bq2b"].astype(jnp.float32)
        zcol = jnp.zeros((H, 1), jnp.float32)
        # Head weights padded to 2 output lanes each: Q1 -> column 0, Q2 -> column 1.
        wq1c = jnp.concatenate([params["wq1c"], zcol], axis=1).astype(weight_dtype)
        wq2c = jnp.concatenate([zcol, params["wq2c"]], axis=1).astype(weight_dtype)
        packed += [wq1b, bq1b, wq2b, bq2b, wq1c, wq2c, bqc]
    else:
        wqb = _block_diag(params["wq1b"], params["wq2b"]).astype(weight_dtype)
        bqb = jnp.concatenate([params["bq1b"], params["bq2b"]], axis=1).astype(jnp.float32)
        wqc = _block_diag(params["wq1c"], params["wq2c"]).astype(weight_dtype)
        packed += [wqb, bqb, wqc, bqc]
    return packed


# --------------------------------------------------------------------------- #
# Wrapper
# --------------------------------------------------------------------------- #
def _round_up(x, m):
    return ((x + m - 1) // m) * m


def qnetwork_forward(state, action, params, *, weight_dtype=jnp.bfloat16,
                     batch_tile=512):
    # Pre-concatenate state|action once in the wrapper; layer-1 weights are
    # block-diagonal to match (no in-kernel lane concat).
    x = jnp.concatenate(
        [state.astype(jnp.float32), action.astype(jnp.float32)], axis=1)
    B, d_in = x.shape
    hidden = params["wq1b"].shape[0]

    # Un-fuse the dominant [2H, 2H] block-diagonal layer whenever the halves
    # are lane-aligned (H multiple of 128); at the module default H=256 the
    # fused form makes the MXU push ~2x the necessary work.
    split_qb = (hidden % 128 == 0) and (hidden >= 128)
    packed = pack_params(params, weight_dtype, split_qb=split_qb)

    # Batch tiling: tb is a multiple of 8 (or == B), capped at 1024 so the
    # (tb, 2H) fp32 intermediates stay far below the scoped VMEM limits on
    # every generation, and the grid gets >= 2 steps whenever the batch allows
    # it so both of v7x's TensorCores receive work.
    batch_tile = max(8, (min(int(batch_tile), 1024) // 8) * 8)
    if B <= 2 * batch_tile:
        tb = min(B, _round_up(pl.cdiv(B, 2), 8))
    else:
        tb = batch_tile
    grid = (pl.cdiv(B, tb),)

    def resident(p):
        # Constant block index: fetched once, stays resident in VMEM across
        # all grid steps.
        return pl.BlockSpec(p.shape, lambda i: (0,) * p.ndim)

    in_specs = [pl.BlockSpec((tb, d_in), lambda i: (i, 0))]
    in_specs += [resident(p) for p in packed]
    out_spec = pl.BlockSpec((tb, 2), lambda i: (i, 0))

    out = pl.pallas_call(
        make_qnetwork_kernel(split_qb),
        out_shape=jax.ShapeDtypeStruct((B, 2), jnp.float32),
        grid=grid,
        in_specs=in_specs,
        out_specs=out_spec,
        compiler_params=pltpu.CompilerParams(
            dimension_semantics=("parallel",)),
    )(x, *packed)

    return out[:, 0:1], out[:, 1:2]


# --------------------------------------------------------------------------- #
# Pure-JAX references
# --------------------------------------------------------------------------- #
def qnetwork_ref(state, action, params):
    """Unfused fp32 reference mirroring the original PyTorch module."""
    def lin(x, w, b):
        return x @ w + b

    def lin_relu(x, w, b):
        return jnp.maximum(lin(x, w, b), 0.0)

    sf = lin_relu(lin_relu(state, params["ws1"], params["bs1"]),
                  params["ws2"], params["bs2"])
    af = lin_relu(lin_relu(action, params["wa1"], params["ba1"]),
                  params["wa2"], params["ba2"])
    c = jnp.concatenate([sf, af], axis=1)
    h1 = lin_relu(lin_relu(c, params["wq1a"], params["bq1a"]),
                  params["wq1b"], params["bq1b"])
    q1 = lin(h1, params["wq1c"], params["bq1c"])
    h2 = lin_relu(lin_relu(c, params["wq2a"], params["bq2a"]),
                  params["wq2b"], params["bq2b"])
    q2 = lin(h2, params["wq2c"], params["bq2c"])
    return q1, q2


def qnetwork_ref_cast(state, action, params, weight_dtype):
    """Unfused reference applying the kernel's dtype handling (low-precision
    weights + per-dot activation cast, fp32 accumulation and elementwise)."""
    def lin(x, w, b):
        w = w.astype(weight_dtype)
        return jnp.dot(x.astype(w.dtype), w,
                       preferred_element_type=jnp.float32) + b

    def lin_relu(x, w, b):
        return jnp.maximum(lin(x, w, b), 0.0)

    sf = lin_relu(lin_relu(state.astype(jnp.float32), params["ws1"], params["bs1"]),
                  params["ws2"], params["bs2"])
    af = lin_relu(lin_relu(action.astype(jnp.float32), params["wa1"], params["ba1"]),
                  params["wa2"], params["ba2"])
    c = jnp.concatenate([sf, af], axis=1)
    h1 = lin_relu(lin_relu(c, params["wq1a"], params["bq1a"]),
                  params["wq1b"], params["bq1b"])
    q1 = lin(h1, params["wq1c"], params["bq1c"])
    h2 = lin_relu(lin_relu(c, params["wq2a"], params["bq2a"]),
                  params["wq2b"], params["bq2b"])
    q2 = lin(h2, params["wq2c"], params["bq2c"])
    return q1, q2


# --------------------------------------------------------------------------- #
# Demo / correctness check
# --------------------------------------------------------------------------- #
if __name__ == "__main__":
    B = 16
    STATE_DIM = 12
    ACTION_DIM = 6

    key = jax.random.PRNGKey(0)
    k_state, k_action, k_p1, k_p2 = jax.random.split(key, 4)

    state = jax.random.normal(k_state, (B, STATE_DIM), jnp.float32)
    action = jax.random.normal(k_action, (B, ACTION_DIM), jnp.float32)

    # 1) Small hidden size (fused Q-tower path), fp32 weights, strict check.
    params_small = make_params(STATE_DIM, ACTION_DIM, 32, k_p1)
    q1, q2 = qnetwork_forward(state, action, params_small,
                              weight_dtype=jnp.float32)
    jax.block_until_ready((q1, q2))
    q1_ref, q2_ref = qnetwork_ref(state, action, params_small)
    assert q1.shape == (B, 1) and q2.shape == (B, 1)
    assert jnp.allclose(q1, q1_ref, atol=1e-3, rtol=1e-3)
    assert jnp.allclose(q2, q2_ref, atol=1e-3, rtol=1e-3)

    # 2) Lane-aligned hidden size (exercises the split Q-tower path; small
    #    stand-in for the module default hidden_size=256), fp32 weights.
    HIDDEN = 128
    params_big = make_params(STATE_DIM, ACTION_DIM, HIDDEN, k_p2)
    q1f, q2f = qnetwork_forward(state, action, params_big,
                                weight_dtype=jnp.float32)
    jax.block_until_ready((q1f, q2f))
    q1f_ref, q2f_ref = qnetwork_ref(state, action, params_big)
    assert jnp.allclose(q1f, q1f_ref, atol=1e-3, rtol=1e-3)
    assert jnp.allclose(q2f, q2f_ref, atol=1e-3, rtol=1e-3)

    # 3) Default bf16-weight path (MXU-native on v6e/v7x), checked against a
    #    pure-JAX reference applying the identical casts.
    q1b, q2b = qnetwork_forward(state, action, params_big)
    jax.block_until_ready((q1b, q2b))
    q1b_ref, q2b_ref = qnetwork_ref_cast(state, action, params_big, jnp.bfloat16)
    assert jnp.allclose(q1b, q1b_ref, atol=1e-2, rtol=1e-2)
    assert jnp.allclose(q2b, q2b_ref, atol=1e-2, rtol=1e-2)

    print("KERNEL_OK")
</pallas_src>

<mosaic_0001>
module attributes {stable_mosaic.version = 11 : i64} {
  func.func @kernel(%arg0: i32, %arg1: memref<8x18xf32, #tpu.memory_space<vmem>>, %arg2: memref<18x64xf32, #tpu.memory_space<vmem>>, %arg3: memref<1x64xf32, #tpu.memory_space<vmem>>, %arg4: memref<64x64xf32, #tpu.memory_space<vmem>>, %arg5: memref<1x64xf32, #tpu.memory_space<vmem>>, %arg6: memref<64x64xf32, #tpu.memory_space<vmem>>, %arg7: memref<1x64xf32, #tpu.memory_space<vmem>>, %arg8: memref<64x64xf32, #tpu.memory_space<vmem>>, %arg9: memref<1x64xf32, #tpu.memory_space<vmem>>, %arg10: memref<64x2xf32, #tpu.memory_space<vmem>>, %arg11: memref<1x2xf32, #tpu.memory_space<vmem>>, %arg12: memref<8x2xf32, #tpu.memory_space<vmem>>) attributes {dimension_semantics = [#tpu.dimension_semantics<parallel>], iteration_bounds = array<i64: 2>, scalar_prefetch = 0 : i64, scratch_operands = 0 : i64, tpu.core_type = #tpu.core_type<tc>, window_params = [{transform_indices = @transform_0, window_bounds = array<i64: 8, 18>}, {pipeline_mode = #tpu.pipeline_mode<synchronous>, transform_indices = @transform_1, window_bounds = array<i64: 18, 64>}, {pipeline_mode = #tpu.pipeline_mode<synchronous>, transform_indices = @transform_2, window_bounds = array<i64: 1, 64>}, {pipeline_mode = #tpu.pipeline_mode<synchronous>, transform_indices = @transform_3, window_bounds = array<i64: 64, 64>}, {pipeline_mode = #tpu.pipeline_mode<synchronous>, transform_indices = @transform_4, window_bounds = array<i64: 1, 64>}, {pipeline_mode = #tpu.pipeline_mode<synchronous>, transform_indices = @transform_5, window_bounds = array<i64: 64, 64>}, {pipeline_mode = #tpu.pipeline_mode<synchronous>, transform_indices = @transform_6, window_bounds = array<i64: 1, 64>}, {pipeline_mode = #tpu.pipeline_mode<synchronous>, transform_indices = @transform_7, window_bounds = array<i64: 64, 64>}, {pipeline_mode = #tpu.pipeline_mode<synchronous>, transform_indices = @transform_8, window_bounds = array<i64: 1, 64>}, {pipeline_mode = #tpu.pipeline_mode<synchronous>, transform_indices = @transform_9, window_bounds = array<i64: 64, 2>}, {pipeline_mode = #tpu.pipeline_mode<synchronous>, transform_indices = @transform_10, window_bounds = array<i64: 1, 2>}, {transform_indices = @transform_11, window_bounds = array<i64: 8, 2>}]} {
    %c0 = arith.constant 0 : index
    %c0_0 = arith.constant 0 : index
    %0 = vector.load %arg1[%c0, %c0_0] : memref<8x18xf32, #tpu.memory_space<vmem>>, vector<8x18xf32>
    %c0_1 = arith.constant 0 : index
    %c0_2 = arith.constant 0 : index
    %1 = vector.load %arg2[%c0_1, %c0_2] : memref<18x64xf32, #tpu.memory_space<vmem>>, vector<18x64xf32>
    %cst = arith.constant dense<0.000000e+00> : vector<8x64xf32>
    %2 = tpu.matmul %0, %1, %cst {dimension_numbers = #tpu.dot_dimension_numbers<[1], [0], [0], [1], [0, 0, 1, 1], [], []>} : vector<8x18xf32>, vector<18x64xf32>, vector<8x64xf32> -> vector<8x64xf32>
    %c0_3 = arith.constant 0 : index
    %c0_4 = arith.constant 0 : index
    %3 = vector.load %arg3[%c0_3, %c0_4] : memref<1x64xf32, #tpu.memory_space<vmem>>, vector<1x64xf32>
    %4 = vector.broadcast %3 : vector<1x64xf32> to vector<8x64xf32>
    %5 = arith.addf %2, %4 : vector<8x64xf32>
    %cst_5 = arith.constant 0.000000e+00 : f32
    %6 = vector.broadcast %cst_5 : f32 to vector<8x64xf32>
    %7 = arith.maximumf %5, %6 : vector<8x64xf32>
    %c0_6 = arith.constant 0 : index
    %c0_7 = arith.constant 0 : index
    %8 = vector.load %arg4[%c0_6, %c0_7] : memref<64x64xf32, #tpu.memory_space<vmem>>, vector<64x64xf32>
    %cst_8 = arith.constant dense<0.000000e+00> : vector<8x64xf32>
    %9 = tpu.matmul %7, %8, %cst_8 {dimension_numbers = #tpu.dot_dimension_numbers<[1], [0], [0], [1], [0, 0, 1, 1], [], []>} : vector<8x64xf32>, vector<64x64xf32>, vector<8x64xf32> -> vector<8x64xf32>
    %c0_9 = arith.constant 0 : index
    %c0_10 = arith.constant 0 : index
    %10 = vector.load %arg5[%c0_9, %c0_10] : memref<1x64xf32, #tpu.memory_space<vmem>>, vector<1x64xf32>
    %11 = vector.broadcast %10 : vector<1x64xf32> to vector<8x64xf32>
    %12 = arith.addf %9, %11 : vector<8x64xf32>
    %cst_11 = arith.constant 0.000000e+00 : f32
    %13 = vector.broadcast %cst_11 : f32 to vector<8x64xf32>
    %14 = arith.maximumf %12, %13 : vector<8x64xf32>
    %c0_12 = arith.constant 0 : index
    %c0_13 = arith.constant 0 : index
    %15 = vector.load %arg6[%c0_12, %c0_13] : memref<64x64xf32, #tpu.memory_space<vmem>>, vector<64x64xf32>
    %cst_14 = arith.constant dense<0.000000e+00> : vector<8x64xf32>
    %16 = tpu.matmul %14, %15, %cst_14 {dimension_numbers = #tpu.dot_dimension_numbers<[1], [0], [0], [1], [0, 0, 1, 1], [], []>} : vector<8x64xf32>, vector<64x64xf32>, vector<8x64xf32> -> vector<8x64xf32>
    %c0_15 = arith.constant 0 : index
    %c0_16 = arith.constant 0 : index
    %17 = vector.load %arg7[%c0_15, %c0_16] : memref<1x64xf32, #tpu.memory_space<vmem>>, vector<1x64xf32>
    %18 = vector.broadcast %17 : vector<1x64xf32> to vector<8x64xf32>
    %19 = arith.addf %16, %18 : vector<8x64xf32>
    %cst_17 = arith.constant 0.000000e+00 : f32
    %20 = vector.broadcast %cst_17 : f32 to vector<8x64xf32>
    %21 = arith.maximumf %19, %20 : vector<8x64xf32>
    %c0_18 = arith.constant 0 : index
    %c0_19 = arith.constant 0 : index
    %22 = vector.load %arg8[%c0_18, %c0_19] : memref<64x64xf32, #tpu.memory_space<vmem>>, vector<64x64xf32>
    %cst_20 = arith.constant dense<0.000000e+00> : vector<8x64xf32>
    %23 = tpu.matmul %21, %22, %cst_20 {dimension_numbers = #tpu.dot_dimension_numbers<[1], [0], [0], [1], [0, 0, 1, 1], [], []>} : vector<8x64xf32>, vector<64x64xf32>, vector<8x64xf32> -> vector<8x64xf32>
    %c0_21 = arith.constant 0 : index
    %c0_22 = arith.constant 0 : index
    %24 = vector.load %arg9[%c0_21, %c0_22] : memref<1x64xf32, #tpu.memory_space<vmem>>, vector<1x64xf32>
    %25 = vector.broadcast %24 : vector<1x64xf32> to vector<8x64xf32>
    %26 = arith.addf %23, %25 : vector<8x64xf32>
    %cst_23 = arith.constant 0.000000e+00 : f32
    %27 = vector.broadcast %cst_23 : f32 to vector<8x64xf32>
    %28 = arith.maximumf %26, %27 : vector<8x64xf32>
    %c0_24 = arith.constant 0 : index
    %c0_25 = arith.constant 0 : index
    %29 = vector.load %arg10[%c0_24, %c0_25] : memref<64x2xf32, #tpu.memory_space<vmem>>, vector<64x2xf32>
    %cst_26 = arith.constant dense<0.000000e+00> : vector<8x2xf32>
    %30 = tpu.matmul %28, %29, %cst_26 {dimension_numbers = #tpu.dot_dimension_numbers<[1], [0], [0], [1], [0, 0, 1, 1], [], []>} : vector<8x64xf32>, vector<64x2xf32>, vector<8x2xf32> -> vector<8x2xf32>
    %c0_27 = arith.constant 0 : index
    %c0_28 = arith.constant 0 : index
    %31 = vector.load %arg11[%c0_27, %c0_28] : memref<1x2xf32, #tpu.memory_space<vmem>>, vector<1x2xf32>
    %32 = vector.broadcast %31 : vector<1x2xf32> to vector<8x2xf32>
    %33 = arith.addf %30, %32 : vector<8x2xf32>
    %c0_29 = arith.constant 0 : index
    %c0_30 = arith.constant 0 : index
    %34 = vector.load %arg12[%c0_29, %c0_30] : memref<8x2xf32, #tpu.memory_space<vmem>>, vector<8x2xf32>
    tpu.vector_store %arg12[%c0_29, %c0_30], %33 {strides = array<i32>} : memref<8x2xf32, #tpu.memory_space<vmem>>, vector<8x2xf32>,
    return
  }
  func.func @transform_0(%arg0: i32) -> (i32, i32) {
    %c0_i32 = arith.constant 0 : i32
    %c0_i32_0 = arith.constant 0 : i32
    return %arg0, %c0_i32 : i32, i32
  }
  func.func @transform_1(%arg0: i32) -> (i32, i32) {
    %c0_i32 = arith.constant 0 : i32
    %c0_i32_0 = arith.constant 0 : i32
    %c0_i32_1 = arith.constant 0 : i32
    return %c0_i32, %c0_i32_0 : i32, i32
  }
  func.func @transform_2(%arg0: i32) -> (i32, i32) {
    %c0_i32 = arith.constant 0 : i32
    %c0_i32_0 = arith.constant 0 : i32
    %c0_i32_1 = arith.constant 0 : i32
    return %c0_i32, %c0_i32_0 : i32, i32
  }
  func.func @transform_3(%arg0: i32) -> (i32, i32) {
    %c0_i32 = arith.constant 0 : i32
    %c0_i32_0 = arith.constant 0 : i32
    %c0_i32_1 = arith.constant 0 : i32
    return %c0_i32, %c0_i32_0 : i32, i32
  }
  func.func @transform_4(%arg0: i32) -> (i32, i32) {
    %c0_i32 = arith.constant 0 : i32
    %c0_i32_0 = arith.constant 0 : i32
    %c0_i32_1 = arith.constant 0 : i32
    return %c0_i32, %c0_i32_0 : i32, i32
  }
  func.func @transform_5(%arg0: i32) -> (i32, i32) {
    %c0_i32 = arith.constant 0 : i32
    %c0_i32_0 = arith.constant 0 : i32
    %c0_i32_1 = arith.constant 0 : i32
    return %c0_i32, %c0_i32_0 : i32, i32
  }
  func.func @transform_6(%arg0: i32) -> (i32, i32) {
    %c0_i32 = arith.constant 0 : i32
    %c0_i32_0 = arith.constant 0 : i32
    %c0_i32_1 = arith.constant 0 : i32
    return %c0_i32, %c0_i32_0 : i32, i32
  }
  func.func @transform_7(%arg0: i32) -> (i32, i32) {
    %c0_i32 = arith.constant 0 : i32
    %c0_i32_0 = arith.constant 0 : i32
    %c0_i32_1 = arith.constant 0 : i32
    return %c0_i32, %c0_i32_0 : i32, i32
  }
  func.func @transform_8(%arg0: i32) -> (i32, i32) {
    %c0_i32 = arith.constant 0 : i32
    %c0_i32_0 = arith.constant 0 : i32
    %c0_i32_1 = arith.constant 0 : i32
    return %c0_i32, %c0_i32_0 : i32, i32
  }
  func.func @transform_9(%arg0: i32) -> (i32, i32) {
    %c0_i32 = arith.constant 0 : i32
    %c0_i32_0 = arith.constant 0 : i32
    %c0_i32_1 = arith.constant 0 : i32
    return %c0_i32, %c0_i32_0 : i32, i32
  }
  func.func @transform_10(%arg0: i32) -> (i32, i32) {
    %c0_i32 = arith.constant 0 : i32
    %c0_i32_0 = arith.constant 0 : i32
    %c0_i32_1 = arith.constant 0 : i32
    return %c0_i32, %c0_i32_0 : i32, i32
  }
  func.func @transform_11(%arg0: i32) -> (i32, i32) {
    %c0_i32 = arith.constant 0 : i32
    %c0_i32_0 = arith.constant 0 : i32
    return %arg0, %c0_i32 : i32, i32
  }
}

</mosaic_0001>

<bundles_post_ra>
// kernel: tpu_custom_call.1
= control target key start
LH: loop header
LB: loop body
LE: loop exit
PB: predicated region body
PF: predicated region fallthrough
CT: control target
= control target key end

     0   :  { %s1804_s0 = inlined_call_operand.hbm [shape: f32[16,18], index: 0, kind: input, shape index: {}]   ;;  %s1805_s1 = inlined_call_operand.hbm [shape: f32[18,64], index: 1, kind: input, shape index: {}]   ;;  %s1806_s2 = inlined_call_operand.vmem [shape: f32[1,64], index: 2, kind: input, shape index: {}]   ;;  %s1807_s3 = inlined_call_operand.vmem [shape: f32[64,64], index: 3, kind: input, shape index: {}]   ;;  %s1808_s4 = inlined_call_operand.vmem [shape: f32[1,64], index: 4, kind: input, shape index: {}]   ;;  %s1809_s5 = inlined_call_operand.hbm [shape: f32[64,64], index: 5, kind: input, shape index: {}]   ;;  %s1810_s6 = inlined_call_operand.vmem [shape: f32[1,64], index: 6, kind: input, shape index: {}]   ;;  %s1811_s7 = inlined_call_operand.hbm [shape: f32[64,64], index: 7, kind: input, shape index: {}]   ;;  %s1812_s8 = inlined_call_operand.vmem [shape: f32[1,64], index: 8, kind: input, shape index: {}]   ;;  %s1813_s9 = inlined_call_operand.vmem [shape: f32[64,2], index: 9, kind: input, shape index: {}]   ;;  %s1814_s10 = inlined_call_operand.vmem [shape: f32[1,2], index: 10, kind: input, shape index: {}]   ;;  %s1815_s11 = inlined_call_operand.vmem [shape: f32[16,2], index: 11, kind: output, shape index: {}]  }
   0x1   :  { %1819 = sst [smem:[#allocation12_spill]] %s1812_s8 }
   0x2   :  { %1820 = sst [smem:[#allocation13_spill]] %s1814_s10 }
   0x3   :  { %1821 = sst [smem:[#allocation14_spill]] %s1815_s11 }
   0x4   :  { %16 = vsyncpa [#allocation3], 0 }
   0x5   :  { %18 = vsyncpa [#allocation3 + $0x1], 0 }
   0x6   :  { %19 = vsyncpa [#allocation5], 0 }
   0x7   :  { %20 = vsyncpa [#allocation8], 0  ;;  %s1493_s17 = smov 0   ;;  %s1495_s18 = smov 0  }
   0x8   :  { %s1497_s19 = smov 0   ;;  %s1499_s20 = smov 0  }
   0x9 LB: > { %s1512_s21 = sadd.s32 4294967295, %s1422_s20   ;;  %p46_p0 = scmp.ne.s32.totalorder %s1414_s18, %s1410_s17  ;;  %s1422_s20 = sphi %s1499_s20, %s1840_s20   ;;  %s1418_s19 = sphi %s1497_s19, %s1839_s19   ;;  %s1414_s18 = sphi %s1495_s18, %s1838_s18   ;;  %s1410_s17 = sphi %s1493_s17, %s1837_s17  }
   0xa   : > { %p1816_p1 = scmp.eq.s32.totalorder %s1512_s21, 0  ;;  %p989_p2 = scmp.ge.s32.totalorder %s1422_s20, 1 }
   0xb   : > { %p293_p3 = scmp.lt.s32.totalorder %s1422_s20, 3  ;;  %s1424_s24 = smov [#allocation4]  }
   0xc   : > { %p1520_p4 = por %p1816_p1, %p46_p0  ;;  %s305_s25 = sshll.u32 %s1424_s24, 4  ;;  %s1528_s25 = int_to_ptr.vmem [resolvable:$true] %s305_s25 }
   0xd   : > { %p1524_p5 = pnand %p989_p2, %p293_p3  ;;  %s1425_s27 = smov [#allocation6]  }
   0xe   : > { %s1822_s22 = scalar_select %p1520_p4, 1, 0 }
   0xf   : > { %s1823_s23 = scalar_select %p1524_p5, 1, 0 }
  0x10   : > { %p1205_p6 = pneg %p1524_p5  ;;  %s327_s28 = sshll.u32 %s1425_s27, 4  ;;  %s1538_s28 = int_to_ptr.vmem [resolvable:$true] %s327_s28 }
  0x11   : > { %s1426_s29 = smov [#allocation7]   ;;  %s1266_s14 = scalar_lea.hbm %s1805_s1, 384 }
  0x12   : > { %p1534_p7 = pnand %p1205_p6, %p1816_p1  ;;  %s1540_s30 = sshll.u32 %s1426_s29, 4  ;;  %s344_s30 = int_to_ptr.vmem [resolvable:$true] %s1540_s30 }
  0x13   : > { %p1267_p8 = scmp.ne.s32.totalorder %s1805_s1, %s1266_s14  ;;  %p1273_p12 = scmp.lt.u32.totalorder %s1266_s14, %s1805_s1 }
  0x14   : > { %p1550_p9 = pneg %p1534_p7 }
  0x16   : > { %p1269_p10 = pnand %p1550_p9, %p1267_p8 }
  0x18   : > { %p1270_p11 = pneg %p1269_p10 }
  0x1a   : > { %p1275_p13 = pnand %p1273_p12, %p1270_p11 }
  0x1c   : > { %1278 = shalt.err (!%p1275_p13)
}
  0x1d   : > { %s1279_s29 = scalar_lea.vmem %s1528_s25, 384  ;;  %p1287_p6 = scmp.lt.s32.totalorder %s1528_s25, %s1528_s25 }
  0x1e   : > { %p1280_p0 = scmp.ne.s32.totalorder %s1528_s25, %s1279_s29  ;;  %p1288_p1 = scmp.lt.s32.totalorder %s1279_s29, %s1279_s29 }
  0x20   : > { %p1282_p2 = pnand %p1280_p0, %p1550_p9  ;;  %p1289_p8 = por %p1288_p1, %p1287_p6 }
  0x22   : > { %p1283_p3 = pneg %p1282_p2 }
  0x24   : > { %p1290_p10 = pnand %p1289_p8, %p1283_p3 }
  0x26   : > { %1293 = shalt.err (!%p1290_p10)
}
  0x27   : > { %s1427_s12 = smov 128   ;;  %s1428_s13 = smov 8  }
  0x28   : > { %1208 = dma.hbm_to_vmem [thread:$0]  (!%p1534_p7), %s1805_s1, 384, %s1528_s25, [#allocation5], %s1427_s12, %s1427_s12, %s1428_s13  }
  0x29   : > { %s1294_s27 = scalar_lea.hbm %s1809_s5, 1024 }
  0x2a   : > { %p1295_p1 = scmp.ne.s32.totalorder %s1809_s5, %s1294_s27  ;;  %p1301_p13 = scmp.lt.u32.totalorder %s1294_s27, %s1809_s5 }
  0x2c   : > { %p1297_p11 = pnand %p1295_p1, %p1550_p9 }
  0x2e   : > { %p1298_p12 = pneg %p1297_p11 }
  0x30   : > { %p1303_p0 = pnand %p1301_p13, %p1298_p12 }
  0x32   : > { %1306 = shalt.err (!%p1303_p0)
}
  0x33   : > { %s1307_s25 = scalar_lea.vmem %s1538_s28, 1024  ;;  %p1315_p8 = scmp.lt.s32.totalorder %s1538_s28, %s1538_s28 }
  0x34   : > { %p1308_p2 = scmp.ne.s32.totalorder %s1538_s28, %s1307_s25  ;;  %p1316_p10 = scmp.lt.s32.totalorder %s1307_s25, %s1307_s25 }
  0x36   : > { %p1310_p3 = pnand %p1308_p2, %p1550_p9  ;;  %p1317_p1 = por %p1316_p10, %p1315_p8 }
  0x38   : > { %p1311_p6 = pneg %p1310_p3 }
  0x3a   : > { %p1318_p11 = pnand %p1317_p1, %p1311_p6 }
  0x3c   : > { %1321 = shalt.err (!%p1318_p11)
}
  0x3d   : > { %1211 = dma.hbm_to_vmem [thread:$0]  (!%p1534_p7), %s1809_s5, 1024, %s1538_s28, [#allocation5], %s1427_s12, %s1427_s12, %s1428_s13  }
  0x3e   : > { %s1322_s15 = scalar_lea.hbm %s1811_s7, 1024 }
  0x3f   : > { %p1323_p12 = scmp.ne.s32.totalorder %s1811_s7, %s1322_s15  ;;  %p1329_p2 = scmp.lt.u32.totalorder %s1322_s15, %s1811_s7 }
  0x41   : > { %p1325_p13 = pnand %p1323_p12, %p1550_p9 }
  0x43   : > { %p1326_p0 = pneg %p1325_p13 }
  0x45   : > { %p1331_p3 = pnand %p1329_p2, %p1326_p0 }
  0x47   : > { %1334 = shalt.err (!%p1331_p3)
}
  0x48   : > { %s1335_s25 = scalar_lea.vmem %s344_s30, 1024  ;;  %p1343_p1 = scmp.lt.s32.totalorder %s344_s30, %s344_s30 }
  0x49   : > { %p1336_p6 = scmp.ne.s32.totalorder %s344_s30, %s1335_s25  ;;  %p1344_p11 = scmp.lt.s32.totalorder %s1335_s25, %s1335_s25 }
  0x4b   : > { %p1338_p8 = pnand %p1336_p6, %p1550_p9  ;;  %p1345_p4 = por %p1344_p11, %p1343_p1 }
  0x4d   : > { %p1339_p10 = pneg %p1338_p8 }
  0x4f   : > { %p1346_p5 = pnand %p1345_p4, %p1339_p10 }
  0x51   : > { %1349 = shalt.err (!%p1346_p5)
}
  0x52   : > { %1214 = dma.hbm_to_vmem [thread:$0]  (!%p1534_p7), %s1811_s7, 1024, %s344_s30, [#allocation8], %s1427_s12, %s1427_s12, %s1428_s13  }
  0x53   : > { %s1623_s17 = sadd.s32 1, %s1422_s20   ;;  %s33_s10 = sadd.s32 1, %s1418_s19 }
  0x54   : > { %s30_s26 = ssub.s32 %s1422_s20, %s1623_s17  ;;  %p40_p5 = scmp.ne.s32.totalorder %s1418_s19, %s1414_s18 }
  0x55   : > { %p31_p4 = scmp.eq.s32.totalorder %s30_s26, 0  ;;  %p41_p9 = scmp.eq.s32.totalorder %s1422_s20, 0 }
  0x56   : > { %p1222_p12 = scmp.lt.s32.totalorder %s1422_s20, 2  ;;  %s366_s14 = sand.u32 1, %s1418_s19  }
  0x57   : > { %s1633_s11 = scalar_select %p31_p4, %s1418_s19, %s33_s10  }
  0x58   : > { %p42_p13 = por %p41_p9, %p40_p5  ;;  %s994_s15 = sshll.u32 %s366_s14, 3 }
  0x59   : > { %s995_s16 = sshll.u32 %s1422_s20, 7  ;;  %s370_s30 = scalar_lea.vmem [#allocation2], %s994_s15 }
  0x5a   : > { %s1640_s29 = scalar_lea.hbm %s1804_s0, %s995_s16  ;;  %s377_s12 = sshll.u32 %s370_s30, 4  ;;  %s1642_s12 = int_to_ptr.vmem [resolvable:$true] %s377_s12 }
  0x5b   : > { %p1644_p7 = pnand %p1222_p12, %p42_p13  ;;  %s367_s20 = scalar_lea.sflag [#allocation3], %s366_s14 }
  0x5c   : > { %s1350_s25 = scalar_lea.hbm %s1640_s29, 128  ;;  %s1355_s26 = scalar_lea.hbm %s1804_s0, 256 }
  0x5d   : > { %p1351_p0 = scmp.ne.s32.totalorder %s1640_s29, %s1350_s25  ;;  %p1352_p2 = pneg %p1644_p7 }
  0x5e   : > { %p1356_p8 = scmp.lt.u32.totalorder %s1640_s29, %s1804_s0  ;;  %p1357_p10 = scmp.lt.u32.totalorder %s1355_s26, %s1350_s25 }
  0x5f   : > { %p1353_p3 = pnand %p1352_p2, %p1351_p0  ;;  %p1359_p11 = scmp.lt.u32.totalorder %s1350_s25, %s1640_s29 }
  0x60   : > { %p1358_p1 = por %p1357_p10, %p1356_p8 }
  0x61   : > { %p1354_p6 = pneg %p1353_p3 }
  0x62   : > { %p1360_p4 = por %p1359_p11, %p1358_p1 }
  0x64   : > { %p1361_p5 = pnand %p1360_p4, %p1354_p6 }
  0x66   : > { %1364 = shalt.err (!%p1361_p5)
}
  0x67   : > { %s1365_s14 = scalar_lea.vmem %s1642_s12, 128  ;;  %s1429_s16 = smov [#allocation2]  }
  0x68   : > { %p1366_p9 = scmp.ne.s32.totalorder %s1642_s12, %s1365_s14  ;;  %s1370_s24 = sshll.u32 %s1429_s16, 4  ;;  %s1371_s24 = int_to_ptr.vmem [resolvable:$false] %s1370_s24 }
  0x69   : > { %s1372_s27 = scalar_lea.vmem %s1371_s24, 256  ;;  %p1373_p0 = scmp.lt.s32.totalorder %s1642_s12, %s1371_s24 }
  0x6a   : > { %p1368_p12 = pnand %p1366_p9, %p1352_p2  ;;  %p1374_p3 = scmp.lt.s32.totalorder %s1372_s27, %s1365_s14 }
  0x6c   : > { %p1369_p13 = pneg %p1368_p12  ;;  %p1375_p8 = por %p1374_p3, %p1373_p0 }
  0x6e   : > { %p1376_p10 = pnand %p1375_p8, %p1369_p13 }
  0x70   : > { %1379 = shalt.err (!%p1376_p10)
}
  0x71   : > { %1218 = dma.hbm_to_vmem [thread:$0]  (!%p1644_p7), %s1640_s29, 128, %s1642_s12, %s367_s20  }
  0x72   : > { %p1827_p6 = scmp.ne.s32.totalorder %s1823_s23, 0 }
  0x73   : > { %s388_s30 = sand.u32 (!%p1827_p6), 1, %s1414_s18   ;;  %p1828_p2 = scmp.ne.s32.totalorder (!%p1827_p6), %s1822_s22, 0 }
  0x74   : > { %386 = sbr.rel (%p1827_p6) target bundleno = 1217 (0x4c1), region = 64  ;;  %s1676_s25 = sshll.u32 (!%p1827_p6), %s388_s30, 3 }
  0x75   : > { %s389_s28 = scalar_lea.sflag (!%p1827_p6), [#allocation3], %s388_s30  ;;  %s392_s8 = scalar_lea.vmem (!%p1827_p6), [#allocation2], %s1676_s25 }
  0x7b   : > { %1397 = dma.done.wait (%p1828_p2), %s389_s28, 128  }
  0x7c   : > { %1399 = vsyncadd (%p1828_p2), %s389_s28, 4294967168  ;;  %p1829_p1 = scmp.eq.s32.totalorder %s1512_s21, 0 }
  0x7e   : > { %1401 = dma.done.wait (%p1829_p1), [#allocation5], 1408   ;;  %p1830_p7 = pmov %p1829_p1 }
  0x7f   : > { %p1831_p11 = pmov %p1829_p1 }
  0x80   : > { %1403 = vsyncadd (%p1830_p7), [#allocation5], 4294965888 }
  0x81   : > { %1405 = dma.done.wait (%p1831_p11), [#allocation8], 1024   ;;  %p1832_p4 = pmov %p1829_p1 }
  0x82   : > { %v1430_v0 = vmov 0.0|0.0   ;;  %vm1431_vm0 = vmmov 0   ;;  %v1432_v1 = vmov 0.0   ;;  %v447_v2 = vld [vmem:[#allocation4] sm:$0xff]  ;;  %v448_v3 = vld [vmem:[#allocation4 + $0x8] sm:$0xff]  ;;  %v536_v5 = vld [vmem:[%s1807_s3] sm:$0xff] }
  0x83   : > { %1407 = vsyncadd (%p1832_p4), [#allocation8], 4294966272  ;;  %1140 = vmatprep.subr.bf16.mxu0 %v1430_v0  ;;  %1061 = vmatprep.mubr.msk.f32.mxu0 %vm1431_vm0, %v1432_v1  ;;  %v1141_v4 = vpack.c.bf16 %v448_v3, %v447_v2  ;;  %v537_v6 = vld [vmem:[%s1807_s3 + $0x8] sm:$0xff]  ;;  %v538_v8 = vld [vmem:[%s1807_s3 + $0x10] sm:$0xff]  ;;  %vm461_vm1 = vcmask 1041408   ;;  %vm457_vm2 = vcmask 146432  }
  0x84   : > { %1143 = vmatprep.subr.bf16.mxu1 %v1430_v0  ;;  %1080 = vmatprep.mubr.msk.f32.mxu1 %vm1431_vm0, %v1432_v1  ;;  %v1144_v7 = vpack.c.bf16 %v537_v6, %v536_v5  ;;  %v539_v9 = vld [vmem:[%s1807_s3 + $0x18] sm:$0xff]  ;;  %v449_v10 = vld [vmem:[#allocation4 + $0x10] sm:$0x3]  ;;  %v541_v14 = vld [vmem:[%s1807_s3 + $0x28] sm:$0xff]  ;;  %vm551_vm3 = vcmask 523264   ;;  %s1833_s26 = sld [smem:[#allocation12_spill]] }
  0x85   : > { %1142 = vmatpush3.bf16.msra.mxu0 %v1141_v4  ;;  %v1147_v11 = vpack.c.bf16 %v539_v9, %v538_v8  ;;  %v446_v12 = vld [vmem:[%s392_s8] sm:$0xff]  ;;  %v542_v16 = vld [vmem:[%s1807_s3 + $0x30] sm:$0xff]  ;;  %v543_v17 = vld [vmem:[%s1807_s3 + $0x38] sm:$0xff]  ;;  %p442_p5 = scmp.lt.s32.totalorder %s1512_s21, 1  ;;  %s1834_s16 = sld [smem:[#allocation13_spill]]  ;;  %vm892_vm4 = vcmask 15360  }
  0x86   : > { %1059 = vmatprep.subr.mxu0 %v1432_v1  ;;  %1145 = vmatpush3.bf16.msra.mxu1 %v1144_v7  ;;  %v540_v13 = vld [vmem:[%s1807_s3 + $0x20] sm:$0xff]  ;;  %v1153_v18 = vpack.c.bf16 %v543_v17, %v542_v16  ;;  %v626_v19 = vld [vmem:[#allocation6] sm:$0xff]  ;;  %v627_v20 = vld [vmem:[#allocation6 + $0x8] sm:$0xff]  ;;  %s1835_s30 = sld [smem:[#allocation14_spill]] }
  0x87   : > { %1146 = vmatprep.subr.bf16.mxu1 %v1430_v0  ;;  %v1150_v15 = vpack.c.bf16 %v541_v14, %v540_v13  ;;  %v628_v21 = vld [vmem:[#allocation6 + $0x10] sm:$0xff]  ;;  %v1156_v22 = vpack.c.bf16 %v627_v20, %v626_v19  ;;  %v629_v23 = vld [vmem:[#allocation6 + $0x18] sm:$0xff]  ;;  %v630_v25 = vld [vmem:[#allocation6 + $0x20] sm:$0xff]  ;;  %s1842_s21 = smov (!%p442_p5, %s1512_s21), 1 }
  0x88   : > { %v1159_v24 = vpack.c.bf16 %v629_v23, %v628_v21  ;;  %v631_v26 = vld [vmem:[#allocation6 + $0x28] sm:$0xff]  ;;  %v1002_v28 = vld [vmem:[%s1806_s2] ss:$0 sm:$0xff]  ;;  %v632_v33 = vld [vmem:[#allocation6 + $0x30] sm:$0xff]  ;;  %s1001_s10 = sshll.u32 %s1842_s21, 3 }
  0x89   : > { %1060 = vmatpush3.msk.msra.mxu0 %vm461_vm1, %v449_v10  ;;  %v1162_v27 = vpack.c.bf16 %v631_v26, %v630_v25  ;;  %v633_v34 = vld [vmem:[#allocation6 + $0x38] sm:$0xff]  ;;  %v715_v36 = vld [vmem:[#allocation7] sm:$0xff]  ;;  %v716_v37 = vld [vmem:[#allocation7 + $0x8] sm:$0xff] }
  0x8a   : > { %1062 = vmatmul.mubr.msk.f32.vlgmr.msra.gmra.mrb[0].mxu0 %vm457_vm2, %v446_v12  ;;  %1148 = vmatpush3.bf16.msra.mxu1 %v1147_v11  ;;  %v1165_v35 = vpack.c.bf16 %v633_v34, %v632_v33  ;;  %v717_v38 = vld [vmem:[#allocation7 + $0x10] sm:$0xff]  ;;  %v1168_v39 = vpack.c.bf16 %v716_v37, %v715_v36  ;;  %v718_v40 = vld [vmem:[#allocation7 + $0x18] sm:$0xff]  ;;  %v719_v42 = vld [vmem:[#allocation7 + $0x20] sm:$0xff] }
  0x8b   : > { %1149 = vmatprep.subr.bf16.mxu1 %v1430_v0  ;;  %1155 = vmatprep.subr.bf16.mxu0 %v1430_v0  ;;  %v1171_v41 = vpack.c.bf16 %v718_v40, %v717_v38  ;;  %v720_v43 = vld [vmem:[#allocation7 + $0x28] sm:$0xff]  ;;  %v1005_v45 = vld [vmem:[%s1808_s4] ss:$0 sm:$0xff]  ;;  %v721_v50 = vld [vmem:[#allocation7 + $0x30] sm:$0xff] }
  0x8c   : > { %1099 = vmatprep.mubr.msk.f32.mxu0 %vm1431_vm0, %v1432_v1  ;;  %1157 = vmatpush3.bf16.msra.mxu0 %v1156_v22  ;;  %v1174_v44 = vpack.c.bf16 %v720_v43, %v719_v42  ;;  %v722_v51 = vld [vmem:[#allocation7 + $0x38] sm:$0xff]  ;;  %v805_v54 = vld [vmem:[%s1813_s9 + $0x8] sm:$0xff]  ;;  %v806_v55 = vld [vmem:[%s1813_s9 + $0x10] sm:$0xff]  ;;  %s445_s25 = scalar_lea.vmem %s1835_s30, %s1001_s10 }
  0x8d   : > { %1158 = vmatprep.subr.bf16.mxu0 %v1430_v0  ;;  %v1177_v52 = vpack.c.bf16 %v722_v51, %v721_v50  ;;  %v804_v53 = vld [vmem:[%s1813_s9] sm:$0xff]  ;;  %v807_v57 = vld [vmem:[%s1813_s9 + $0x18] sm:$0xff]  ;;  %v809_v60 = vld [vmem:[%s1813_s9 + $0x28] sm:$0xff] }
  0x8e   : > { %1151 = vmatpush3.bf16.msra.mxu1 %v1150_v15  ;;  %v1180_v56 = vpack.c.bf16 %v805_v54, %v804_v53  ;;  %v1183_v58 = vpack.c.bf16 %v807_v57, %v806_v55  ;;  %v808_v59 = vld [vmem:[%s1813_s9 + $0x20] sm:$0xff]  ;;  %v810_v4 = vld [vmem:[%s1813_s9 + $0x30] sm:$0xff] }
  0x8f   : > { %1152 = vmatprep.subr.bf16.mxu1 %v1430_v0  ;;  %v1186_v61 = vpack.c.bf16 %v809_v60, %v808_v59  ;;  %v1007_v62 = vld [vmem:[%s1810_s6] ss:$0 sm:$0xff] }
  0x90   : > { %1160 = vmatpush3.bf16.msra.mxu0 %v1159_v24  ;;  %v1009_v6 = vld [vmem:[%s1833_s26] ss:$0 sm:$0xff] }
  0x91   : > { %1161 = vmatprep.subr.bf16.mxu0 %v1430_v0  ;;  %v1011_v11 = vld [vmem:[%s1834_s16] ss:$0 sm:$0xff] }
  0x92   : > { %1154 = vmatpush3.bf16.msra.mxu1 %v1153_v18 }
  0x93   : > { %1167 = vmatprep.subr.bf16.mxu1 %v1430_v0 }
  0x94   : > { %1163 = vmatpush3.bf16.msra.mxu0 %v1162_v27 }
  0x95   : > { %1164 = vmatprep.subr.bf16.mxu0 %v1430_v0 }
  0x98   : > { %1166 = vmatpush3.bf16.msra.mxu0 %v1165_v35 }
  0x99   : > { %1179 = vmatprep.subr.bf16.mxu0 %v1430_v0 }
 0x15d   : > { %v531_v29 = vpop.f32.mrb[0].mxu0 }
 0x15e   : > { %v532_v30 = vadd.f32 %v1002_v28, %v531_v29  ;;  %v1063_v31 = vpop.f32.mrb[1].mxu0 }
 0x160   : > { %v535_v32 = vmax.f32 %v532_v30, 0.0 }
 0x162   : > { %1081 = vmatmul.mubr.msk.f32.vlgmr.msra.gmra.mrb[0].mxu1 %vm551_vm3, %v535_v32 }
 0x163   : > { %1118 = vmatprep.mubr.msk.f32.mxu1 %vm1431_vm0, %v1432_v1  ;;  %1169 = vmatpush3.bf16.msra.mxu1 %v1168_v39 }
 0x164   : > { %1170 = vmatprep.subr.bf16.mxu1 %v1430_v0 }
 0x167   : > { %1172 = vmatpush3.bf16.msra.mxu1 %v1171_v41 }
 0x168   : > { %1173 = vmatprep.subr.bf16.mxu1 %v1430_v0 }
 0x16b   : > { %1175 = vmatpush3.bf16.msra.mxu1 %v1174_v44 }
 0x16c   : > { %1176 = vmatprep.subr.bf16.mxu1 %v1430_v0 }
 0x16f   : > { %1178 = vmatpush3.bf16.msra.mxu1 %v1177_v52 }
 0x235   : > { %v621_v46 = vpop.f32.mrb[0].mxu1 }
 0x236   : > { %v622_v47 = vadd.f32 %v1005_v45, %v621_v46  ;;  %v1082_v48 = vpop.f32.mrb[1].mxu1 }
 0x238   : > { %v625_v49 = vmax.f32 %v622_v47, 0.0 }
 0x23a   : > { %1100 = vmatmul.mubr.msk.f32.vlgmr.msra.gmra.mrb[2].mxu0 %vm551_vm3, %v625_v49 }
 0x23b   : > { %1137 = vmatprep.mubr.msk.f32.mxu0 %vm1431_vm0, %v1432_v1  ;;  %1181 = vmatpush3.bf16.msra.mxu0 %v1180_v56 }
 0x23c   : > { %1182 = vmatprep.subr.bf16.mxu0 %v1430_v0 }
 0x23f   : > { %1184 = vmatpush3.bf16.msra.mxu0 %v1183_v58 }
 0x240   : > { %1185 = vmatprep.subr.bf16.mxu0 %v1430_v0 }
 0x243   : > { %1187 = vmatpush3.bf16.msra.mxu0 %v1186_v61 }
 0x244   : > { %1188 = vmatprep.subr.bf16.mxu0 %v1430_v0  ;;  %v811_v0 = vld [vmem:[%s1813_s9 + $0x38] sm:$0xff] }
 0x245   : > { %v1189_v5 = vpack.c.bf16 %v811_v0, %v810_v4 }
 0x247   : > { %1190 = vmatpush3.bf16.msra.mxu0 %v1189_v5 }
 0x30d   : > { %v710_v63 = vpop.f32.mrb[2].mxu0 }
 0x30e   : > { %v711_v1 = vadd.f32 %v1007_v62, %v710_v63  ;;  %v1101_v2 = vpop.f32.mrb[3].mxu0 }
 0x310   : > { %v714_v3 = vmax.f32 %v711_v1, 0.0 }
 0x312   : > { %1119 = vmatmul.mubr.msk.f32.vlgmr.msra.gmra.mrb[2].mxu1 %vm551_vm3, %v714_v3 }
 0x3e5   : > { %v799_v7 = vpop.f32.mrb[2].mxu1 }
 0x3e6   : > { %v800_v8 = vadd.f32 %v1009_v6, %v799_v7  ;;  %v1120_v9 = vpop.f32.mrb[3].mxu1 }
 0x3e8   : > { %v803_v10 = vmax.f32 %v800_v8, 0.0 }
 0x3ea   : > { %1138 = vmatmul.mubr.msk.f32.vlgmr.msra.gmra.mrb[4].mxu0 %vm551_vm3, %v803_v10 }
 0x4bd   : > { %v888_v12 = vpop.f32.mrb[4].mxu0 }
 0x4be   : > { %v889_v13 = vadd.f32 %v1011_v11, %v888_v12  ;;  %v1139_v14 = vpop.f32.mrb[5].mxu0 }
 0x4c0   : > { %893 = vst.msk [vmem:[%s445_s25] sm:$0xff] %vm892_vm4, %v889_v13 }
 0x4c1 PF: > { %s1836_s28 = smov %s1623_s17  ;;  %p23_p9 = scmp.ge.s32.totalorder %s1623_s17, 4  }
 0x4c2   : > { %s1837_s17 = smov %s1414_s18  ;;  %s1838_s18 = smov %s1418_s19 }
 0x4c3   : > { %s1839_s19 = smov %s1633_s11  ;;  %s1840_s20 = smov %s1836_s28 }
 0x4c4   :  { %25 = sbr.rel (!%p23_p9) target bundleno = 9 (0x9), region = 116 }
 0x4cb   :  { %913 = vsyncpa [#allocation3], 1 }
 0x4cc   :  { %915 = vsyncpa [#allocation3 + $0x1], 1 }
 0x4cd   :  { %916 = vsyncpa [#allocation5], 1 }
 0x4ce   :  { %917 = vsyncpa [#allocation8], 1 }

</bundles_post_ra>
